<compile_context>
chip_gen: v7x
topology: tpu7x:2x2x1
jax: 0.10.0
libtpu: 0.0.40
codegen_flags: <defaults>
</compile_context>

<pallas_src>
import functools

import jax
import jax.numpy as jnp
import numpy as np
from jax.experimental import pallas as pl
from jax.experimental.pallas import tpu as pltpu


def _round_up(x, m):
    return ((x + m - 1) // m) * m


def _mlp_kernel(layer_dims, row_pad, x_ref, p_ref, o_ref):
    """Forward for one lane-tile of points.

    x_ref: (dim_in, T)   — points on the lane axis.
    p_ref: (num_layers*row_pad, col_pad) fused parameter slab; layer l occupies
           rows [l*row_pad, l*row_pad+out_l): W_l (out,in) at cols [0, in_l),
           bias b_l at col in_l.
    o_ref: (dim_out, T)
    """
    x = x_ref[...].astype(jnp.float32)
    # Per-point L2 normalization over the feature (sublane) axis.
    # No epsilon, matching torch: an all-zero input point produces NaN.
    sumsq = jnp.sum(x * x, axis=0, keepdims=True)        # (1, T) sublane reduce
    h = x * jax.lax.rsqrt(sumsq)                         # EUP rsqrt + VPU mul

    num_layers = len(layer_dims)
    for l, (in_l, out_l) in enumerate(layer_dims):
        r0 = l * row_pad                                  # static Python ints
        w = p_ref[r0:r0 + out_l, 0:in_l].astype(jnp.float32)          # (out, in)
        b = p_ref[r0:r0 + out_l, in_l:in_l + 1].astype(jnp.float32)   # (out, 1)
        # TODO(synk): on v6e/v7x the first layer (K=dim_in=4) could be done as
        # 4 VPU broadcast multiply-adds instead of a zero-padded MXU matmul;
        # kept on the MXU for simplicity — the layer is tiny either way.
        h = jnp.dot(w, h, preferred_element_type=jnp.float32) + b
        if l != num_layers - 1:
            h = jnp.maximum(h, 0.0)

    o_ref[...] = h.astype(o_ref.dtype)


def _pick_col_tile(n_pad, max_tile=2048):
    """Largest multiple of 128 dividing n_pad (capped at max_tile), keeping at
    least 2 grid steps when possible so v7x's two TensorCores both get work."""
    if n_pad <= 128:
        return n_pad
    cap = min(max_tile, n_pad // 2)
    tile = 128
    t = 128
    while t <= cap:
        if n_pad % t == 0:
            tile = t
        t += 128
    return tile


def mlp_forward(x, weights, biases, *, col_tile=None):
    """x: (N, dim_in). weights[l]: (in_l, out_l). biases[l]: (out_l,).
    Returns (N, dim_out) — matches torch MLP.forward (opt=None path)."""
    num_layers = len(weights)
    N, dim_in = x.shape
    dim_out = weights[-1].shape[1]
    layer_dims = tuple((w.shape[0], w.shape[1]) for w in weights)

    # ---- fused, (8,128)-aligned parameter slab ------------------------------
    max_out = max(o for _, o in layer_dims)
    max_in = max(i for i, _ in layer_dims)
    row_pad = _round_up(max_out, 8)
    col_pad = _round_up(max_in + 1, 128)      # +1 column for the bias
    slab = jnp.zeros((num_layers * row_pad, col_pad), dtype=jnp.float32)
    for l, (w, b) in enumerate(zip(weights, biases)):
        in_l, out_l = w.shape
        r0 = l * row_pad
        slab = slab.at[r0:r0 + out_l, 0:in_l].set(w.T.astype(jnp.float32))
        slab = slab.at[r0:r0 + out_l, in_l:in_l + 1].set(
            b.reshape(out_l, 1).astype(jnp.float32))

    # ---- transpose to lane-dense layout & pad the point axis ----------------
    n_pad = N if N <= 128 else _round_up(N, 128)
    x_t = x.T                                                 # (dim_in, N)
    if n_pad != N:
        # Pad with ones (non-zero) so the eps-free normalization stays NaN-free
        # in the padded columns; they are sliced off after the kernel.
        pad = jnp.ones((dim_in, n_pad - N), dtype=x.dtype)
        x_t = jnp.concatenate([x_t, pad], axis=1)

    if col_tile is None:
        col_tile = _pick_col_tile(n_pad)
    assert n_pad % col_tile == 0

    kernel = functools.partial(_mlp_kernel, layer_dims, row_pad)

    out_t = pl.pallas_call(
        kernel,
        out_shape=jax.ShapeDtypeStruct((dim_out, n_pad), x.dtype),
        grid_spec=pltpu.PrefetchScalarGridSpec(
            num_scalar_prefetch=0,
            grid=(n_pad // col_tile,),
            in_specs=[
                pl.BlockSpec((dim_in, col_tile), lambda i: (0, i)),
                # Constant block index -> parameter slab stays VMEM-resident,
                # no per-step re-DMA.
                pl.BlockSpec(slab.shape, lambda i: (0, 0)),
            ],
            out_specs=pl.BlockSpec((dim_out, col_tile), lambda i: (0, i)),
        ),
        compiler_params=pltpu.CompilerParams(
            dimension_semantics=("parallel",)),
    )(x_t, slab)

    return out_t.T[:N]


def _reference(x, weights, biases):
    norm = jnp.sqrt(jnp.sum(x * x, axis=1, keepdims=True))
    h = x / norm
    num_layers = len(weights)
    for l in range(num_layers):
        h = h @ weights[l] + biases[l]
        if l != num_layers - 1:
            h = jnp.maximum(h, 0.0)
    return h


if __name__ == "__main__":
    # Module hyper-parameters (small, consistent with a NeRF MLP):
    dim_in, dim_out, dim_hidden, num_layers = 4, 4, 32, 3
    N = 256  # number of points (rows)

    key = jax.random.PRNGKey(0)
    kx, *kws = jax.random.split(key, 1 + 2 * num_layers)

    x = jax.random.normal(kx, (N, dim_in), dtype=jnp.float32)

    # Deterministic parameter init (PyTorch-style shapes: Linear(in_l, out_l)).
    weights, biases = [], []
    for l in range(num_layers):
        in_l = dim_in if l == 0 else dim_hidden
        out_l = dim_out if l == num_layers - 1 else dim_hidden
        bound = 1.0 / np.sqrt(in_l)
        w = jax.random.uniform(kws[2 * l], (in_l, out_l),
                               minval=-bound, maxval=bound, dtype=jnp.float32)
        b = jax.random.uniform(kws[2 * l + 1], (out_l,),
                               minval=-bound, maxval=bound, dtype=jnp.float32)
        weights.append(w)
        biases.append(b)

    out = mlp_forward(x, weights, biases)
    out = jax.block_until_ready(out)

    ref = _reference(x, weights, biases)
    np.testing.assert_allclose(np.asarray(out), np.asarray(ref),
                               rtol=1e-5, atol=1e-5)

    print("KERNEL_OK")
</pallas_src>

<mosaic_0001>
module attributes {stable_mosaic.version = 11 : i64} {
  func.func @_mlp_kernel(%arg0: i32, %arg1: memref<4x128xf32, #tpu.memory_space<vmem>>, %arg2: memref<96x128xf32, #tpu.memory_space<vmem>>, %arg3: memref<4x128xf32, #tpu.memory_space<vmem>>) attributes {dimension_semantics = [#tpu.dimension_semantics<parallel>], iteration_bounds = array<i64: 2>, scalar_prefetch = 0 : i64, scratch_operands = 0 : i64, tpu.core_type = #tpu.core_type<tc>, window_params = [{transform_indices = @transform_0, window_bounds = array<i64: 4, 128>}, {pipeline_mode = #tpu.pipeline_mode<synchronous>, transform_indices = @transform_1, window_bounds = array<i64: 96, 128>}, {transform_indices = @transform_2, window_bounds = array<i64: 4, 128>}]} {
    %c0 = arith.constant 0 : index
    %c0_0 = arith.constant 0 : index
    %0 = vector.load %arg1[%c0, %c0_0] : memref<4x128xf32, #tpu.memory_space<vmem>>, vector<4x128xf32>
    %1 = arith.mulf %0, %0 : vector<4x128xf32>
    %cst = arith.constant dense<0.000000e+00> : vector<128xf32>
    %2 = vector.multi_reduction <add>, %1, %cst [0] : vector<4x128xf32> to vector<128xf32>
    %3 = vector.shape_cast %2 : vector<128xf32> to vector<1x128xf32>
    %4 = math.rsqrt %3 : vector<1x128xf32>
    %5 = vector.broadcast %4 : vector<1x128xf32> to vector<4x128xf32>
    %6 = arith.mulf %0, %5 : vector<4x128xf32>
    %c0_1 = arith.constant 0 : index
    %c0_2 = arith.constant 0 : index
    %7 = vector.load %arg2[%c0_1, %c0_2] : memref<96x128xf32, #tpu.memory_space<vmem>>, vector<32x4xf32>
    %c0_3 = arith.constant 0 : index
    %c4 = arith.constant 4 : index
    %8 = vector.load %arg2[%c0_3, %c4] : memref<96x128xf32, #tpu.memory_space<vmem>>, vector<32x1xf32>
    %cst_4 = arith.constant dense<0.000000e+00> : vector<32x128xf32>
    %9 = tpu.matmul %7, %6, %cst_4 {dimension_numbers = #tpu.dot_dimension_numbers<[1], [0], [0], [1], [0, 0, 1, 1], [], []>} : vector<32x4xf32>, vector<4x128xf32>, vector<32x128xf32> -> vector<32x128xf32>
    %10 = vector.broadcast %8 : vector<32x1xf32> to vector<32x128xf32>
    %11 = arith.addf %9, %10 : vector<32x128xf32>
    %cst_5 = arith.constant 0.000000e+00 : f32
    %12 = vector.broadcast %cst_5 : f32 to vector<32x128xf32>
    %13 = arith.maximumf %11, %12 : vector<32x128xf32>
    %c32 = arith.constant 32 : index
    %c0_6 = arith.constant 0 : index
    %14 = vector.load %arg2[%c32, %c0_6] : memref<96x128xf32, #tpu.memory_space<vmem>>, vector<32x32xf32>
    %c32_7 = arith.constant 32 : index
    %c32_8 = arith.constant 32 : index
    %15 = vector.load %arg2[%c32_7, %c32_8] : memref<96x128xf32, #tpu.memory_space<vmem>>, vector<32x1xf32>
    %cst_9 = arith.constant dense<0.000000e+00> : vector<32x128xf32>
    %16 = tpu.matmul %14, %13, %cst_9 {dimension_numbers = #tpu.dot_dimension_numbers<[1], [0], [0], [1], [0, 0, 1, 1], [], []>} : vector<32x32xf32>, vector<32x128xf32>, vector<32x128xf32> -> vector<32x128xf32>
    %17 = vector.broadcast %15 : vector<32x1xf32> to vector<32x128xf32>
    %18 = arith.addf %16, %17 : vector<32x128xf32>
    %cst_10 = arith.constant 0.000000e+00 : f32
    %19 = vector.broadcast %cst_10 : f32 to vector<32x128xf32>
    %20 = arith.maximumf %18, %19 : vector<32x128xf32>
    %c64 = arith.constant 64 : index
    %c0_11 = arith.constant 0 : index
    %21 = vector.load %arg2[%c64, %c0_11] : memref<96x128xf32, #tpu.memory_space<vmem>>, vector<4x32xf32>
    %c64_12 = arith.constant 64 : index
    %c32_13 = arith.constant 32 : index
    %22 = vector.load %arg2[%c64_12, %c32_13] : memref<96x128xf32, #tpu.memory_space<vmem>>, vector<4x1xf32>
    %cst_14 = arith.constant dense<0.000000e+00> : vector<4x128xf32>
    %23 = tpu.matmul %21, %20, %cst_14 {dimension_numbers = #tpu.dot_dimension_numbers<[1], [0], [0], [1], [0, 0, 1, 1], [], []>} : vector<4x32xf32>, vector<32x128xf32>, vector<4x128xf32> -> vector<4x128xf32>
    %24 = vector.broadcast %22 : vector<4x1xf32> to vector<4x128xf32>
    %25 = arith.addf %23, %24 : vector<4x128xf32>
    %c0_15 = arith.constant 0 : index
    %c0_16 = arith.constant 0 : index
    %26 = vector.load %arg3[%c0_15, %c0_16] : memref<4x128xf32, #tpu.memory_space<vmem>>, vector<4x128xf32>
    tpu.vector_store %arg3[%c0_15, %c0_16], %25 {strides = array<i32>} : memref<4x128xf32, #tpu.memory_space<vmem>>, vector<4x128xf32>,
    return
  }
  func.func @transform_0(%arg0: i32) -> (i32, i32) {
    %c0_i32 = arith.constant 0 : i32
    %c0_i32_0 = arith.constant 0 : i32
    return %c0_i32, %arg0 : i32, i32
  }
  func.func @transform_1(%arg0: i32) -> (i32, i32) {
    %c0_i32 = arith.constant 0 : i32
    %c0_i32_0 = arith.constant 0 : i32
    %c0_i32_1 = arith.constant 0 : i32
    return %c0_i32, %c0_i32_0 : i32, i32
  }
  func.func @transform_2(%arg0: i32) -> (i32, i32) {
    %c0_i32 = arith.constant 0 : i32
    %c0_i32_0 = arith.constant 0 : i32
    return %c0_i32, %arg0 : i32, i32
  }
}

</mosaic_0001>

<bundles_post_ra>
// kernel: tpu_custom_call.1
= control target key start
LH: loop header
LB: loop body
LE: loop exit
PB: predicated region body
PF: predicated region fallthrough
CT: control target
= control target key end

     0   :  { %7 = vsyncpa [#allocation3], 0  ;;  %s1132_s0 = inlined_call_operand.hbm [shape: f32[4,256], index: 0, kind: input, shape index: {}]   ;;  %s1133_s1 = inlined_call_operand.hbm [shape: f32[96,128], index: 1, kind: input, shape index: {}]   ;;  %s1134_s2 = inlined_call_operand.hbm [shape: f32[4,256], index: 2, kind: output, shape index: {}]  }
   0x1   :  { %9 = vsyncpa [#allocation3 + $0x1], 0 }
   0x2   :  { %10 = vsyncpa [#allocation6], 0 }
   0x3   :  { %11 = vsyncpa [#allocation4], 0 }
   0x4   :  { %13 = vsyncpa [#allocation4 + $0x1], 0  ;;  %s920_s9 = smov 0   ;;  %s922_s10 = smov 0  }
   0x5   :  { %s924_s11 = smov 0   ;;  %s926_s12 = smov 0  }
   0x6 LB: > { %s941_s13 = sadd.s32 4294967295, %s893_s12   ;;  %s606_s14 = sadd.s32 4294967294, %s893_s12   ;;  %s893_s12 = sphi %s926_s12, %s1154_s12   ;;  %s889_s11 = sphi %s924_s11, %s1153_s11   ;;  %s885_s10 = sphi %s922_s10, %s1152_s10   ;;  %s881_s9 = sphi %s920_s9, %s1151_s9  }
   0x7   : > { %p39_p0 = scmp.ne.s32.totalorder %s885_s10, %s881_s9  ;;  %p1135_p1 = scmp.eq.s32.totalorder %s941_s13, 0 }
   0x8   : > { %p90_p3 = scmp.eq.s32.totalorder %s606_s14, 1  ;;  %p607_p5 = scmp.ge.s32.totalorder %s893_s12, 1 }
   0x9   : > { %p950_p4 = por %p1135_p1, %p39_p0  ;;  %p97_p7 = scmp.lt.s32.totalorder %s893_s12, 3 }
   0xa   : > { %p955_p6 = por %p90_p3, %p39_p0  ;;  %s895_s18 = smov [#allocation5]  }
   0xb   : > { %s1138_s15 = scalar_select %p950_p4, 1, 0 }
   0xc   : > { %s1139_s16 = scalar_select %p955_p6, 1, 0 }
   0xd   : > { %p960_p8 = pnand %p607_p5, %p97_p7  ;;  %s109_s19 = sshll.u32 %s895_s18, 4  ;;  %s964_s19 = int_to_ptr.vmem [resolvable:$true] %s109_s19 }
   0xe   : > { %s976_s21 = sadd.s32 1, %s893_s12   ;;  %s26_s22 = sadd.s32 1, %s889_s11 }
   0xf   : > { %s1140_s17 = scalar_select %p960_p8, 1, 0 }
  0x10   : > { %p703_p9 = pneg %p960_p8  ;;  %s23_s23 = ssub.s32 %s893_s12, %s976_s21 }
  0x11   : > { %s765_s26 = scalar_lea.hbm %s1133_s1, 1536 }
  0x12   : > { %p971_p11 = pnand %p703_p9, %p1135_p1  ;;  %p766_p12 = scmp.ne.s32.totalorder %s1133_s1, %s765_s26 }
  0x13   : > { %p772_p5 = scmp.lt.u32.totalorder %s765_s26, %s1133_s1 }
  0x14   : > { %p767_p13 = pneg %p971_p11 }
  0x16   : > { %p768_p0 = pnand %p767_p13, %p766_p12 }
  0x18   : > { %p769_p3 = pneg %p768_p0 }
  0x1a   : > { %p774_p7 = pnand %p772_p5, %p769_p3 }
  0x1c   : > { %777 = shalt.err (!%p774_p7)
}
  0x1d   : > { %s778_s3 = scalar_lea.vmem %s964_s19, 1536  ;;  %p786_p2 = scmp.lt.s32.totalorder %s964_s19, %s964_s19 }
  0x1e   : > { %p779_p9 = scmp.ne.s32.totalorder %s964_s19, %s778_s3  ;;  %p787_p6 = scmp.lt.s32.totalorder %s778_s3, %s778_s3 }
  0x20   : > { %p781_p10 = pnand %p779_p9, %p767_p13  ;;  %p788_p4 = por %p787_p6, %p786_p2 }
  0x22   : > { %p782_p1 = pneg %p781_p10 }
  0x24   : > { %p789_p8 = pnand %p788_p4, %p782_p1 }
  0x26   : > { %792 = shalt.err (!%p789_p8)
}
  0x27   : > { %s896_s4 = smov 128   ;;  %s897_s5 = smov 8  }
  0x28   : > { %706 = dma.hbm_to_vmem [thread:$0]  (!%p971_p11), %s1133_s1, 1536, %s964_s19, [#allocation6], %s896_s4, %s896_s4, %s897_s5  }
  0x29   : > { %p24_p2 = scmp.eq.s32.totalorder %s23_s23, 0  ;;  %p33_p1 = scmp.ne.s32.totalorder %s889_s11, %s885_s10 }
  0x2a   : > { %p34_p4 = scmp.eq.s32.totalorder %s893_s12, 0  ;;  %p716_p6 = scmp.lt.s32.totalorder %s893_s12, 2 }
  0x2b   : > { %s1007_s8 = scalar_select %p24_p2, %s889_s11, %s26_s22  }
  0x2c   : > { %p35_p8 = por %p34_p4, %p33_p1  ;;  %p1142_p10 = scmp.eq.s32.totalorder %s941_s13, 1 }
  0x2d   : > { %s123_s18 = sand.u32 1, %s889_s11   ;;  %s611_s24 = sshll.u32 %s893_s12, 6 }
  0x2e   : > { %p1011_p12 = por %p1142_p10, %p33_p1  ;;  %s610_s25 = sshll.u32 %s123_s18, 2 }
  0x2f   : > { %s1020_s27 = scalar_lea.hbm %s1132_s0, %s611_s24  ;;  %s127_s19 = scalar_lea.vmem [#allocation2], %s610_s25 }
  0x30   : > { %s134_s22 = sshll.u32 %s127_s19, 4  ;;  %p1022_p11 = pnand %p716_p6, %p35_p8  ;;  %s1026_s22 = int_to_ptr.vmem [resolvable:$true] %s134_s22 }
  0x31   : > { %s124_s28 = scalar_lea.sflag [#allocation3], %s123_s18  ;;  %s793_s29 = scalar_lea.hbm %s1020_s27, 64 }
  0x32   : > { %p794_p13 = scmp.ne.s32.totalorder %s1020_s27, %s793_s29  ;;  %p795_p0 = pneg %p1022_p11 }
  0x33   : > { %s798_s4 = scalar_lea.hbm %s1132_s0, 128  ;;  %p799_p7 = scmp.lt.u32.totalorder %s1020_s27, %s1132_s0 }
  0x34   : > { %p796_p3 = pnand %p795_p0, %p794_p13  ;;  %p800_p9 = scmp.lt.u32.totalorder %s798_s4, %s793_s29 }
  0x35   : > { %p802_p1 = scmp.lt.u32.totalorder %s793_s29, %s1020_s27 }
  0x36   : > { %p797_p5 = pneg %p796_p3  ;;  %p801_p2 = por %p800_p9, %p799_p7 }
  0x38   : > { %p803_p4 = por %p802_p1, %p801_p2 }
  0x3a   : > { %p804_p6 = pnand %p803_p4, %p797_p5 }
  0x3c   : > { %807 = shalt.err (!%p804_p6)
}
  0x3d   : > { %s808_s7 = scalar_lea.vmem %s1026_s22, 64  ;;  %s898_s18 = smov [#allocation2]  }
  0x3e   : > { %p809_p8 = scmp.ne.s32.totalorder %s1026_s22, %s808_s7  ;;  %s813_s24 = sshll.u32 %s898_s18, 4  ;;  %s814_s24 = int_to_ptr.vmem [resolvable:$false] %s813_s24 }
  0x3f   : > { %s815_s25 = scalar_lea.vmem %s814_s24, 128  ;;  %p816_p3 = scmp.lt.s32.totalorder %s1026_s22, %s814_s24 }
  0x40   : > { %p811_p10 = pnand %p809_p8, %p795_p0  ;;  %p817_p7 = scmp.lt.s32.totalorder %s815_s25, %s808_s7 }
  0x42   : > { %p812_p13 = pneg %p811_p10  ;;  %p818_p9 = por %p817_p7, %p816_p3 }
  0x44   : > { %p819_p2 = pnand %p818_p9, %p812_p13 }
  0x46   : > { %822 = shalt.err (!%p819_p2)
}
  0x47   : > { %710 = dma.hbm_to_vmem [thread:$0]  (!%p1022_p11), %s1020_s27, 64, %s1026_s22, %s124_s28  }
  0x48   : > { %p1145_p5 = scmp.ne.s32.totalorder %s1140_s17, 0 }
  0x49   : > { %s1056_s20 = sand.u32 (!%p1145_p5), 1, %s885_s10   ;;  %p1146_p0 = scmp.ne.s32.totalorder (!%p1145_p5), %s1138_s15, 0 }
  0x4a   : > { %143 = sbr.rel (%p1145_p5) target bundleno = 797 (0x31d), region = 28  ;;  %s613_s26 = sshll.u32 (!%p1145_p5), %s1056_s20, 2 }
  0x4b   : > { %s146_s19 = scalar_lea.sflag (!%p1145_p5), [#allocation3], %s1056_s20  ;;  %s149_s29 = scalar_lea.vmem (!%p1145_p5), [#allocation2], %s613_s26 }
  0x51   : > { %868 = dma.done.wait (%p1146_p0), %s146_s19, 64  }
  0x52   : > { %870 = vsyncadd (%p1146_p0), %s146_s19, 4294967232  ;;  %p1147_p11 = scmp.eq.s32.totalorder %s941_s13, 0 }
  0x54   : > { %872 = dma.done.wait (%p1147_p11), [#allocation6], 1536   ;;  %p1148_p1 = pmov %p1147_p11 }
  0x55   : > { %v899_v0 = vmov 4   ;;  %vm210_vm0 = vcmask 31744   ;;  %v174_v1 = vld [vmem:[%s149_s29] sm:$0xf]  ;;  %vm176_vm1 = vcmask 1043456   ;;  %v186_v2 = vld [vmem:[#allocation5] sm:$0xff] }
  0x56   : > { %874 = vsyncadd (%p1148_p1), [#allocation6], 4294965760  ;;  %759 = vset.pattern.permute.xlu0 %v899_v0  ;;  %760 = vset.pattern.permute.xlu1 %v899_v0  ;;  %v175_v3 = vmul.f32 %v174_v1, %v174_v1  ;;  %v188_v4 = vld [vmem:[#allocation5 + $0x10] sm:$0xff]  ;;  %v187_v7 = vld [vmem:[#allocation5 + $0x8] sm:$0xff]  ;;  %vm335_vm2 = vcmask 261120   ;;  %v900_v18 = vmov 32  }
  0x57   : > { %650 = vmatprep.mubr.msk.f32.mxu0 %vm210_vm0, %v186_v2  ;;  %192 = vperm.xlu0 %759, %v186_v2   ;;  %v189_v8 = vld [vmem:[#allocation5 + $0x18] sm:$0xff]  ;;  %v311_v16 = vld [vmem:[#allocation5 + $0x20] sm:$0xff]  ;;  %v312_v17 = vld [vmem:[#allocation5 + $0x28] sm:$0xff]  ;;  %v901_v40 = vmov 0.0|0.0   ;;  %vm902_vm3 = vmmov 0   ;;  %v903_v41 = vmov 0.0  }
  0x58   : > { %202 = vperm.xlu1 %760, %v188_v4   ;;  %v177_v5 = vsel %vm176_vm1, %v175_v3, 0.0  ;;  %664 = vmatprep.mubr.msk.f32.mxu1 %vm335_vm2, %v311_v16  ;;  %v313_v19 = vld [vmem:[#allocation5 + $0x30] sm:$0xff]  ;;  %v314_v20 = vld [vmem:[#allocation5 + $0x38] sm:$0xff]  ;;  %v433_v21 = vld [vmem:[#allocation5 + $0x40] sm:$0xf]  ;;  %s627_s15 = sshll.u32 %s941_s13, 6 }
  0x59   : > { %v178_v6 = vrot.slane %v177_v5, 4  ;;  %s173_s17 = scalar_lea.vmem [#allocation7], %s613_s26  ;;  %s1088_s28 = scalar_lea.hbm %s1134_s2, %s627_s15 }
  0x5a   : > { %s526_s27 = sshll.u32 %s173_s17, 4  ;;  %s513_s30 = scalar_lea.sflag [#allocation4], %s1056_s20  ;;  %s1090_s27 = int_to_ptr.vmem [resolvable:$true] %s526_s27 }
  0x5b   : > { %197 = vperm.xlu0 %759, %v187_v7   ;;  %v179_v9 = vadd.f32 %v178_v6, %v177_v5  ;;  %s823_s13 = scalar_lea.vmem %s1090_s27, 64  ;;  %s904_s3 = smov [#allocation7]  }
  0x5c   : > { %207 = vperm.xlu1 %760, %v189_v8   ;;  %p824_p4 = scmp.ne.s32.totalorder %s1090_s27, %s823_s13  ;;  %s827_s4 = sshll.u32 %s904_s3, 4  ;;  %s828_s4 = int_to_ptr.vmem [resolvable:$false] %s827_s4 }
  0x5d   : > { %v180_v10 = vrot.slane %v179_v9, 2  ;;  %s829_s5 = scalar_lea.vmem %s828_s4, 128  ;;  %p830_p10 = scmp.lt.s32.totalorder %s1090_s27, %s828_s4 }
  0x5e   : > { %p825_p6 = pnand %p824_p4, %p1011_p12  ;;  %p831_p13 = scmp.lt.s32.totalorder %s829_s5, %s823_s13 }
  0x5f   : > { %v181_v11 = vadd.f32 %v180_v10, %v179_v9  ;;  %761 = vset.pattern.permute.xlu0 %v900_v18 }
  0x60   : > { %762 = vset.pattern.permute.xlu1 %v900_v18  ;;  %317 = vperm.xlu0 %761, %v311_v16   ;;  %p826_p8 = pneg %p825_p6  ;;  %p832_p3 = por %p831_p13, %p830_p10 }
  0x61   : > { %v182_v12 = vrot.slane %v181_v11, 1  ;;  %322 = vperm.xlu1 %762, %v312_v17  }
  0x62   : > { %p833_p7 = pnand %p832_p3, %p826_p8 }
  0x63   : > { %v183_v13 = vadd.f32 %v182_v12, %v181_v11 }
  0x64   : > { %332 = vperm.xlu0 %761, %v314_v20  }
  0x65   : > { %763 = vrsqrt.f32 %v183_v13  ;;  %327 = vperm.xlu1 %762, %v313_v19  }
  0x69   : > { %436 = vperm.xlu1 %762, %v433_v21  }
  0x6f   : > { %v764_v14 = vpop.eup %763 }
  0x70   : > { %v185_v15 = vmul.f32 %v764_v14, %v174_v1 }
  0x72   : > { %648 = vmatprep.subr.msk.mxu0 %vm176_vm1, %v185_v15 }
  0x73   : > { %649 = vmatpush3.msk.msra.mxu0 %vm176_vm1, %v185_v15 }
  0x74   : > { %651 = vmatmul.mubr.msk.f32.vlgmr.msra.gmra.mrb[0].mxu0 %vm210_vm0, %v187_v7  ;;  %689 = vmatprep.subr.bf16.mxu0 %v901_v40 }
  0x75   : > { %653 = vmatprep.mubr.msk.f32.mxu0 %vm210_vm0, %v188_v4 }
  0x78   : > { %654 = vmatmul.mubr.msk.f32.gmra.mrb[2].mxu0 %vm210_vm0, %v189_v8 }
  0x79   : > { %678 = vmatprep.mubr.msk.f32.mxu0 %vm902_vm3, %v903_v41 }
  0xd6   : > { %v193_v22 = vpop.permute.xlu0 %192 }
  0xd7   : > { %v203_v23 = vpop.permute.xlu1 %202 }
  0xda   : > { %v198_v24 = vpop.permute.xlu0 %197 }
  0xdb   : > { %v208_v30 = vpop.permute.xlu1 %207 }
  0xdf   : > { %v318_v42 = vpop.permute.xlu0 %317 }
  0xe0   : > { %v323_v43 = vpop.permute.xlu1 %322 }
  0xe3   : > { %v333_v49 = vpop.permute.xlu0 %332 }
  0xe4   : > { %v328_v52 = vpop.permute.xlu1 %327 }
  0xe8   : > { %v437_v60 = vpop.permute.xlu1 %436 }
 0x147   : > { %v652_v25 = vpop.f32.mrb[0].mxu0 }
 0x148   : > { %v294_v26 = vadd.f32 %v652_v25, %v198_v24  ;;  %v288_v27 = vpop.f32.mrb[1].mxu0 }
 0x149   : > { %v289_v28 = vadd.f32 %v288_v27, %v193_v22 }
 0x14a   : > { %v308_v29 = vmax.f32 %v294_v26, 0.0 }
 0x14b   : > { %v307_v31 = vmax.f32 %v289_v28, 0.0  ;;  %v655_v32 = vpop.f32.mrb[2].mxu0 }
 0x14c   : > { %v304_v33 = vadd.f32 %v655_v32, %v208_v30  ;;  %v298_v34 = vpop.f32.mrb[3].mxu0 }
 0x14d   : > { %v299_v35 = vadd.f32 %v298_v34, %v203_v23  ;;  %v681_v36 = vpack.c.bf16 %v308_v29, %v307_v31 }
 0x14e   : > { %v310_v37 = vmax.f32 %v304_v33, 0.0 }
 0x14f   : > { %v309_v38 = vmax.f32 %v299_v35, 0.0  ;;  %682 = vmatprep.subr.bf16.mxu1 %v681_v36 }
 0x150   : > { %684 = vmatpush3.bf16.msra.mxu1 %v681_v36 }
 0x151   : > { %v685_v39 = vpack.c.bf16 %v310_v37, %v309_v38 }
 0x153   : > { %686 = vmatprep.subr.bf16.mxu1 %v685_v39 }
 0x154   : > { %688 = vmatpush3.bf16.msra.mxu1 %v685_v39 }
 0x157   : > { %665 = vmatmul.mubr.msk.f32.vlgmr.msra.gmra.mrb[0].mxu1 %vm335_vm2, %v312_v17 }
 0x158   : > { %667 = vmatprep.mubr.msk.f32.mxu1 %vm335_vm2, %v313_v19 }
 0x15b   : > { %668 = vmatmul.mubr.msk.f32.gmra.mrb[2].mxu1 %vm335_vm2, %v314_v20 }
 0x22a   : > { %v666_v44 = vpop.f32.mrb[0].mxu1 }
 0x22b   : > { %v416_v45 = vadd.f32 %v666_v44, %v323_v43  ;;  %v410_v46 = vpop.f32.mrb[1].mxu1 }
 0x22c   : > { %v411_v47 = vadd.f32 %v410_v46, %v318_v42 }
 0x22d   : > { %v430_v48 = vmax.f32 %v416_v45, 0.0 }
 0x22e   : > { %v429_v50 = vmax.f32 %v411_v47, 0.0  ;;  %v669_v51 = vpop.f32.mrb[2].mxu1 }
 0x22f   : > { %v426_v53 = vadd.f32 %v669_v51, %v333_v49  ;;  %v420_v54 = vpop.f32.mrb[3].mxu1 }
 0x230   : > { %v690_v55 = vpack.c.bf16 %v430_v48, %v429_v50  ;;  %v421_v56 = vadd.f32 %v420_v54, %v328_v52 }
 0x231   : > { %v432_v57 = vmax.f32 %v426_v53, 0.0 }
 0x232   : > { %v431_v58 = vmax.f32 %v421_v56, 0.0  ;;  %691 = vmatpush3.bf16.msra.mxu0 %v690_v55 }
 0x233   : > { %692 = vmatprep.subr.bf16.mxu0 %v901_v40 }
 0x234   : > { %v693_v59 = vpack.c.bf16 %v432_v57, %v431_v58 }
 0x236   : > { %694 = vmatpush3.bf16.msra.mxu0 %v693_v59 }
 0x239   : > { %679 = vmatmul.mubr.msk.f32.vlgmr.msra.gmra.mrb[4].mxu0 %vm335_vm2, %v433_v21 }
 0x30c   : > { %v507_v61 = vpop.f32.mrb[4].mxu0 }
 0x30d   : > { %v508_v62 = vadd.f32 %v507_v61, %v437_v60  ;;  %v680_v63 = vpop.f32.mrb[5].mxu0 }
 0x30f   : > { %511 = vst [vmem:[%s173_s17] sm:$0xf] %v508_v62 }
 0x310   : > { %836 = shalt.err (!%p833_p7)
}
 0x311   : > { %s837_s6 = scalar_lea.hbm %s1088_s28, 64  ;;  %s841_s24 = scalar_lea.hbm %s1134_s2, 128 }
 0x312   : > { %p838_p9 = scmp.ne.s32.totalorder %s1088_s28, %s837_s6  ;;  %p842_p0 = scmp.lt.u32.totalorder %s1088_s28, %s1134_s2 }
 0x313   : > { %p843_p11 = scmp.lt.u32.totalorder %s841_s24, %s837_s6  ;;  %p845_p4 = scmp.lt.u32.totalorder %s837_s6, %s1088_s28 }
 0x314   : > { %p839_p2 = pnand %p838_p9, %p1011_p12 }
 0x315   : > { %p844_p1 = por %p843_p11, %p842_p0 }
 0x316   : > { %p840_p5 = pneg %p839_p2 }
 0x317   : > { %p846_p6 = por %p845_p4, %p844_p1 }
 0x319   : > { %p847_p8 = pnand %p846_p6, %p840_p5 }
 0x31b   : > { %850 = shalt.err (!%p847_p8)
}
 0x31c   : > { %701 = dma.vmem_to_hbm [thread:$0]  (%p1011_p12), %s1090_s27, 64, %s1088_s28, %s513_s30  }
 0x31d PF: > { %s538_s26 = sand.u32 1, %s881_s9   ;;  %p1149_p10 = scmp.ne.s32.totalorder %s1139_s16, 0 }
 0x31e   : > { %p1150_p13 = scmp.ge.s32.totalorder %s893_s12, 2  ;;  %s539_s19 = scalar_lea.sflag [#allocation4], %s538_s26 }
 0x320   : > { %p712_p3 = pnand %p1150_p13, %p1149_p10 }
 0x322   : > { %876 = dma.done.wait (!%p712_p3), %s539_s19, 64  }
 0x323   : > { %878 = vsyncadd (!%p712_p3), %s539_s19, 4294967232  ;;  %p16_p7 = scmp.ge.s32.totalorder %s976_s21, 4   ;;  %s1151_s9 = smov %s885_s10 }
 0x324   : > { %s1152_s10 = smov %s889_s11  ;;  %s1153_s11 = smov %s1007_s8 }
 0x325   : > { %s1154_s12 = smov %s976_s21  ;;  %18 = sbr.rel (!%p16_p7) target bundleno = 6 (0x6), region = 77 }
 0x32c   :  { %544 = vsyncpa [#allocation3], 1 }
 0x32d   :  { %546 = vsyncpa [#allocation3 + $0x1], 1 }
 0x32e   :  { %547 = vsyncpa [#allocation6], 1 }
 0x32f   :  { %548 = vsyncpa [#allocation4], 1 }
 0x330   :  { %550 = vsyncpa [#allocation4 + $0x1], 1 }

</bundles_post_ra>
